<compile_context>
chip_gen: v6e
topology: v6e:2x2x1
jax: 0.10.0
libtpu: 0.0.40
codegen_flags: <defaults>
</compile_context>

<pallas_src>
import functools

import jax
import jax.numpy as jnp
from jax.experimental import pallas as pl
from jax.experimental.pallas import tpu as pltpu


# ----------------------------------------------------------------------------
# Helpers
# ----------------------------------------------------------------------------
def _round_up(x, m):
    return ((x + m - 1) // m) * m


def _pick_tile(dim, candidates):
    """Largest candidate tile dividing `dim`, preferring >= 2 blocks (v7x megacore)."""
    divisors = [c for c in candidates if dim % c == 0]
    if not divisors:
        return dim
    multi = [c for c in divisors if dim // c >= 2]
    return multi[0] if multi else divisors[0]


# ----------------------------------------------------------------------------
# Fused matmul kernel (single reduction block):
#   out = maybe_relu(X @ W + bias [+ residual])
#   X : [tm, K] (any float dtype, cast to bf16 in-VMEM)   W : [K, tn] bf16
#   bias : [1, tn] f32                                     residual : [tm, tn]
# ----------------------------------------------------------------------------
def _matmul_epilogue_kernel(*refs, relu, has_res):
    if has_res:
        x_ref, w_ref, b_ref, res_ref, o_ref = refs
    else:
        x_ref, w_ref, b_ref, o_ref = refs
        res_ref = None

    out = jnp.dot(x_ref[...].astype(jnp.bfloat16),
                  w_ref[...].astype(jnp.bfloat16),
                  preferred_element_type=jnp.float32)
    out = out + b_ref[...]
    if has_res:
        out = out + res_ref[...].astype(jnp.float32)
    if relu:
        out = jnp.maximum(out, 0.0)
    o_ref[...] = out.astype(o_ref.dtype)


def fused_matmul(x, w, bias, residual=None, relu=False, out_dtype=jnp.float32):
    """Tiled MXU matmul with fused bias / residual / ReLU epilogue (no HBM K/N padding)."""
    M, K = x.shape
    _, N = w.shape

    # Only M might need (tiny) padding so the sublane dim of the X/out blocks is x8.
    Mp = _round_up(max(M, 8), 8)
    if Mp != M:
        x = jnp.pad(x, ((0, Mp - M), (0, 0)))
        if residual is not None:
            residual = jnp.pad(residual, ((0, Mp - M), (0, 0)))

    tm = _pick_tile(Mp, (512, 256, 128, 64, 32, 16, 8))
    # N: lane-dense tiling when 128-divisible, otherwise one full-extent block
    # (legal; avoids an HBM padding copy and a post-kernel slice copy).
    tn = _pick_tile(N, (512, 256, 128)) if N % 128 == 0 else N
    # K: single full-extent block -> no reduction grid axis, no accumulator scratch.

    bias2 = bias.reshape(1, N).astype(jnp.float32)

    in_specs = [
        pl.BlockSpec((tm, K), lambda i, j: (i, 0)),
        pl.BlockSpec((K, tn), lambda i, j: (0, j)),
        pl.BlockSpec((1, tn), lambda i, j: (0, j)),
    ]
    args = [x, w, bias2]
    has_res = residual is not None
    if has_res:
        in_specs.append(pl.BlockSpec((tm, tn), lambda i, j: (i, j)))
        args.append(residual)

    out = pl.pallas_call(
        functools.partial(_matmul_epilogue_kernel, relu=relu, has_res=has_res),
        grid_spec=pltpu.PrefetchScalarGridSpec(
            num_scalar_prefetch=0,
            grid=(Mp // tm, N // tn),
            in_specs=in_specs,
            out_specs=pl.BlockSpec((tm, tn), lambda i, j: (i, j)),
        ),
        out_shape=jax.ShapeDtypeStruct((Mp, N), out_dtype),
        compiler_params=pltpu.CompilerParams(
            dimension_semantics=("parallel", "parallel"),
            vmem_limit_bytes=32 * 1024 * 1024,   # v7x-safe budget
        ),
    )(*args)
    return out[:M] if Mp != M else out


# ----------------------------------------------------------------------------
# Stride-1 3x3 conv kernel: whole padded image resident in VMEM, 9 taps accumulated
# in-kernel (no materialized im2col, activation read from HBM exactly once).
#   x_ref : [Hp, Wp, Cin] bf16     w_ref : [9, Cin, Cout] bf16 (BN folded)
#   b_ref : [1, Cout] f32          o_ref : [Ho, Wo, Cout]
# ----------------------------------------------------------------------------
def _conv3x3_s1_kernel(x_ref, w_ref, b_ref, o_ref, *, relu):
    w = w_ref[...]                      # [9, Cin, Cout]
    b = b_ref[...]                      # [1, Cout]
    Ho, Wo, Cout = o_ref.shape

    def row_body(oh, carry):
        acc = jnp.zeros((Wo, Cout), jnp.float32)
        for i in range(3):              # static tap loops (unrolled)
            row = x_ref[oh + i]         # [Wp, Cin]
            for j in range(3):
                acc = acc + jnp.dot(row[j:j + Wo, :].astype(jnp.bfloat16),
                                    w[3 * i + j],
                                    preferred_element_type=jnp.float32)
        out = acc + b
        if relu:
            out = jnp.maximum(out, 0.0)
        o_ref[oh] = out.astype(o_ref.dtype)
        return carry

    jax.lax.fori_loop(0, Ho, row_body, 0)


def conv3x3_stride1(x_nhwc, w_folded_oihw, bias, padding, relu, out_dtype):
    N, H, W, Cin = x_nhwc.shape
    Cout = w_folded_oihw.shape[0]
    xp = jnp.pad(x_nhwc.astype(jnp.bfloat16),
                 ((0, 0), (padding, padding), (padding, padding), (0, 0)))
    Hp, Wp = H + 2 * padding, W + 2 * padding
    Ho, Wo = Hp - 2, Wp - 2

    w9 = jnp.transpose(w_folded_oihw, (2, 3, 1, 0)).reshape(9, Cin, Cout)
    bias2 = bias.reshape(1, Cout).astype(jnp.float32)

    return pl.pallas_call(
        functools.partial(_conv3x3_s1_kernel, relu=relu),
        grid_spec=pltpu.PrefetchScalarGridSpec(
            num_scalar_prefetch=0,
            grid=(N,),
            in_specs=[
                pl.BlockSpec((None, Hp, Wp, Cin), lambda n: (n, 0, 0, 0)),
                pl.BlockSpec((9, Cin, Cout), lambda n: (0, 0, 0)),
                pl.BlockSpec((1, Cout), lambda n: (0, 0)),
            ],
            out_specs=pl.BlockSpec((None, Ho, Wo, Cout), lambda n: (n, 0, 0, 0)),
        ),
        out_shape=jax.ShapeDtypeStruct((N, Ho, Wo, Cout), out_dtype),
        compiler_params=pltpu.CompilerParams(
            dimension_semantics=("parallel",),
            vmem_limit_bytes=32 * 1024 * 1024,
        ),
    )(xp, w9, bias2)


# ----------------------------------------------------------------------------
# Conv2d + folded BatchNorm (+ residual) (+ ReLU).  Glue in plain JAX, math in Pallas.
# ----------------------------------------------------------------------------
def conv2d_bn_act(x_nhwc, w_oihw, bn, stride=1, padding=0, relu=False,
                  residual=None, eps=1e-5, out_dtype=jnp.float32):
    N, H, W, Cin = x_nhwc.shape
    Cout, _, kh, kw = w_oihw.shape

    # Fold eval-mode BN into the conv weights; only a per-channel f32 bias remains.
    scale = bn["gamma"] / jnp.sqrt(bn["var"] + eps)                  # [Cout]
    bias = bn["beta"] - bn["mean"] * scale                           # [Cout]
    w_folded = (w_oihw * scale[:, None, None, None]).astype(jnp.bfloat16)

    if kh == 1 and kw == 1 and padding == 0:
        xs = x_nhwc[:, ::stride, ::stride, :] if stride != 1 else x_nhwc
        Ho, Wo = xs.shape[1], xs.shape[2]
        X = xs.reshape(N * Ho * Wo, Cin)
        Wm = jnp.transpose(w_folded, (2, 3, 1, 0)).reshape(Cin, Cout)
        res = residual.reshape(N * Ho * Wo, Cout) if residual is not None else None
        y = fused_matmul(X, Wm, bias, residual=res, relu=relu, out_dtype=out_dtype)
        return y.reshape(N, Ho, Wo, Cout)

    # 3x3 conv.
    assert (kh, kw) == (3, 3) and residual is None
    Hp, Wp = H + 2 * padding, W + 2 * padding
    Ho = (Hp - kh) // stride + 1
    Wo = (Wp - kw) // stride + 1

    # Fused (im2col-free) path for stride 1, provided the per-image working set fits VMEM.
    fused_bytes = (2 * Hp * Wp * Cin * 2          # double-buffered bf16 input image
                   + 2 * Ho * Wo * Cout * 2       # double-buffered output image
                   + 9 * Cin * Cout * 2 + Cout * 4)
    if stride == 1 and fused_bytes < 24 * 1024 * 1024:
        return conv3x3_stride1(x_nhwc, w_folded, bias, padding, relu, out_dtype)

    # TODO(synk): stride-2 (or oversized) 3x3 conv still materializes a 9x im2col in HBM.
    xp = jnp.pad(x_nhwc, ((0, 0), (padding, padding), (padding, padding), (0, 0)))
    patches = []
    for i in range(kh):
        for j in range(kw):
            patches.append(xp[:, i:i + stride * Ho:stride,
                              j:j + stride * Wo:stride, :])
    X = jnp.concatenate(patches, axis=-1).reshape(N * Ho * Wo, kh * kw * Cin)
    Wm = jnp.transpose(w_folded, (2, 3, 1, 0)).reshape(kh * kw * Cin, Cout)
    y = fused_matmul(X, Wm, bias, relu=relu, out_dtype=out_dtype)
    return y.reshape(N, Ho, Wo, Cout)


# ----------------------------------------------------------------------------
# BottleneckBlock forward (mirrors the PyTorch module, eval-mode BN)
# ----------------------------------------------------------------------------
def bottleneck_block_forward(params, x_nchw):
    x = jnp.transpose(x_nchw, (0, 2, 3, 1)).astype(jnp.float32)      # NCHW -> NHWC
    stride = params["stride"]

    if "down_w" in params:
        # Produce the downsample residual directly in bf16 (half the HBM round-trip).
        residual = conv2d_bn_act(x, params["down_w"], params["down_bn"],
                                 stride=stride, padding=0, relu=False,
                                 out_dtype=jnp.bfloat16)
    else:
        # Identity residual stays f32 in HBM and is cast in-VMEM by conv3's epilogue.
        residual = x

    out = conv2d_bn_act(x, params["conv1_w"], params["bn1"], stride=1, padding=0,
                        relu=True, out_dtype=jnp.bfloat16)
    out = conv2d_bn_act(out, params["conv2_w"], params["bn2"], stride=stride,
                        padding=1, relu=True, out_dtype=jnp.bfloat16)
    out = conv2d_bn_act(out, params["conv3_w"], params["bn3"], stride=1, padding=0,
                        relu=True, residual=residual, out_dtype=jnp.float32)

    return jnp.transpose(out, (0, 3, 1, 2))                          # NHWC -> NCHW


# ----------------------------------------------------------------------------
# Deterministic parameter init
# ----------------------------------------------------------------------------
class KeyGen:
    def __init__(self, seed=0):
        self._key = jax.random.PRNGKey(seed)

    def __call__(self):
        self._key, sub = jax.random.split(self._key)
        return sub


def kaiming_conv(key, cout, cin, kh, kw):
    std = (2.0 / (cout * kh * kw)) ** 0.5
    return std * jax.random.normal(key, (cout, cin, kh, kw), jnp.float32)


def init_bn(kg, c):
    return dict(gamma=1.0 + 0.1 * jax.random.normal(kg(), (c,), jnp.float32),
                beta=0.1 * jax.random.normal(kg(), (c,), jnp.float32),
                mean=0.1 * jax.random.normal(kg(), (c,), jnp.float32),
                var=1.0 + 0.1 * jax.random.uniform(kg(), (c,), jnp.float32))


def init_bottleneck_block(kg, inplanes, planes, stride=1, expansion=4):
    p = dict(
        stride=stride,
        conv1_w=kaiming_conv(kg(), planes, inplanes, 1, 1), bn1=init_bn(kg, planes),
        conv2_w=kaiming_conv(kg(), planes, planes, 3, 3), bn2=init_bn(kg, planes),
        conv3_w=kaiming_conv(kg(), planes * expansion, planes, 1, 1),
        bn3=init_bn(kg, planes * expansion),
    )
    if stride != 1 or inplanes != planes * expansion:
        p["down_w"] = kaiming_conv(kg(), planes * expansion, inplanes, 1, 1)
        p["down_bn"] = init_bn(kg, planes * expansion)
    return p


# ----------------------------------------------------------------------------
# Pure-JAX reference (f32) for a correctness sanity check
# ----------------------------------------------------------------------------
def _ref_conv_bn_act(x, w_oihw, bn, stride, padding, relu, residual=None, eps=1e-5):
    w = jnp.transpose(w_oihw, (2, 3, 1, 0))                          # HWIO
    y = jax.lax.conv_general_dilated(
        x, w, window_strides=(stride, stride),
        padding=[(padding, padding), (padding, padding)],
        dimension_numbers=("NHWC", "HWIO", "NHWC"))
    scale = bn["gamma"] / jnp.sqrt(bn["var"] + eps)
    y = y * scale + (bn["beta"] - bn["mean"] * scale)
    if residual is not None:
        y = y + residual
    if relu:
        y = jnp.maximum(y, 0.0)
    return y


def _ref_block(params, x_nchw):
    x = jnp.transpose(x_nchw, (0, 2, 3, 1)).astype(jnp.float32)
    stride = params["stride"]
    if "down_w" in params:
        residual = _ref_conv_bn_act(x, params["down_w"], params["down_bn"],
                                    stride, 0, False)
    else:
        residual = x
    out = _ref_conv_bn_act(x, params["conv1_w"], params["bn1"], 1, 0, True)
    out = _ref_conv_bn_act(out, params["conv2_w"], params["bn2"], stride, 1, True)
    out = _ref_conv_bn_act(out, params["conv3_w"], params["bn3"], 1, 0, True,
                           residual=residual)
    return jnp.transpose(out, (0, 3, 1, 2))


# ----------------------------------------------------------------------------
if __name__ == "__main__":
    kg = KeyGen(0)
    x = jax.random.normal(kg(), (2, 64, 16, 16), jnp.float32)        # NCHW

    # Block 1: stride=1, inplanes == planes*4  -> identity residual (fused 3x3 path).
    blk1 = init_bottleneck_block(kg, inplanes=64, planes=16, stride=1)
    # Block 2: stride=2, channel change        -> conv1x1+BN downsample residual.
    blk2 = init_bottleneck_block(kg, inplanes=64, planes=32, stride=2)

    y1 = jax.block_until_ready(bottleneck_block_forward(blk1, x))
    y2 = jax.block_until_ready(bottleneck_block_forward(blk2, x))

    assert y1.shape == (2, 64, 16, 16), y1.shape
    assert y2.shape == (2, 128, 8, 8), y2.shape

    # Numerical sanity check vs f32 reference (tolerance covers bf16 operands).
    r1 = _ref_block(blk1, x)
    r2 = _ref_block(blk2, x)

    def rel_err(a, b):
        return float(jnp.max(jnp.abs(a - b)) / (jnp.max(jnp.abs(b)) + 1e-6))

    e1, e2 = rel_err(y1, r1), rel_err(y2, r2)
    assert e1 < 0.08, f"block1 mismatch: {e1}"
    assert e2 < 0.08, f"block2 mismatch: {e2}"

    print("KERNEL_OK")
</pallas_src>

<mosaic_0001>
module attributes {stable_mosaic.version = 11 : i64} {
  func.func @_matmul_epilogue_kernel(%arg0: i32, %arg1: i32, %arg2: memref<256x64xf32, #tpu.memory_space<vmem>>, %arg3: memref<64x16xbf16, #tpu.memory_space<vmem>>, %arg4: memref<1x16xf32, #tpu.memory_space<vmem>>, %arg5: memref<256x16xbf16, #tpu.memory_space<vmem>>) attributes {dimension_semantics = [#tpu.dimension_semantics<parallel>, #tpu.dimension_semantics<parallel>], iteration_bounds = array<i64: 2, 1>, scalar_prefetch = 0 : i64, scratch_operands = 0 : i64, tpu.core_type = #tpu.core_type<tc>, window_params = [{transform_indices = @transform_0, window_bounds = array<i64: 256, 64>}, {transform_indices = @transform_1, window_bounds = array<i64: 64, 16>}, {transform_indices = @transform_2, window_bounds = array<i64: 1, 16>}, {transform_indices = @transform_3, window_bounds = array<i64: 256, 16>}]} {
    %c0 = arith.constant 0 : index
    %c0_0 = arith.constant 0 : index
    %0 = vector.load %arg2[%c0, %c0_0] : memref<256x64xf32, #tpu.memory_space<vmem>>, vector<256x64xf32>
    %1 = arith.truncf %0 : vector<256x64xf32> to vector<256x64xbf16>
    %c0_1 = arith.constant 0 : index
    %c0_2 = arith.constant 0 : index
    %2 = vector.load %arg3[%c0_1, %c0_2] : memref<64x16xbf16, #tpu.memory_space<vmem>>, vector<64x16xbf16>
    %cst = arith.constant dense<0.000000e+00> : vector<256x16xf32>
    %3 = tpu.matmul %1, %2, %cst {dimension_numbers = #tpu.dot_dimension_numbers<[1], [0], [0], [1], [0, 0, 1, 1], [], []>} : vector<256x64xbf16>, vector<64x16xbf16>, vector<256x16xf32> -> vector<256x16xf32>
    %c0_3 = arith.constant 0 : index
    %c0_4 = arith.constant 0 : index
    %4 = vector.load %arg4[%c0_3, %c0_4] : memref<1x16xf32, #tpu.memory_space<vmem>>, vector<1x16xf32>
    %5 = vector.broadcast %4 : vector<1x16xf32> to vector<256x16xf32>
    %6 = arith.addf %3, %5 : vector<256x16xf32>
    %cst_5 = arith.constant 0.000000e+00 : f32
    %7 = vector.broadcast %cst_5 : f32 to vector<256x16xf32>
    %8 = arith.maximumf %6, %7 : vector<256x16xf32>
    %9 = arith.truncf %8 : vector<256x16xf32> to vector<256x16xbf16>
    %c0_6 = arith.constant 0 : index
    %c0_7 = arith.constant 0 : index
    %10 = vector.load %arg5[%c0_6, %c0_7] : memref<256x16xbf16, #tpu.memory_space<vmem>>, vector<256x16xbf16>
    tpu.vector_store %arg5[%c0_6, %c0_7], %9 {strides = array<i32>} : memref<256x16xbf16, #tpu.memory_space<vmem>>, vector<256x16xbf16>,
    return
  }
  func.func @transform_0(%arg0: i32, %arg1: i32) -> (i32, i32) {
    %c0_i32 = arith.constant 0 : i32
    %c0_i32_0 = arith.constant 0 : i32
    return %arg0, %c0_i32 : i32, i32
  }
  func.func @transform_1(%arg0: i32, %arg1: i32) -> (i32, i32) {
    %c0_i32 = arith.constant 0 : i32
    %c0_i32_0 = arith.constant 0 : i32
    return %c0_i32, %arg1 : i32, i32
  }
  func.func @transform_2(%arg0: i32, %arg1: i32) -> (i32, i32) {
    %c0_i32 = arith.constant 0 : i32
    %c0_i32_0 = arith.constant 0 : i32
    return %c0_i32, %arg1 : i32, i32
  }
  func.func @transform_3(%arg0: i32, %arg1: i32) -> (i32, i32) {
    %c0_i32 = arith.constant 0 : i32
    return %arg0, %arg1 : i32, i32
  }
}

</mosaic_0001>

<bundles_post_ra>
// kernel: tpu_custom_call.1
= control target key start
LH: loop header
LB: loop body
LE: loop exit
PB: predicated region body
PF: predicated region fallthrough
CT: control target
= control target key end

     0   :  { %s1056_s12 = smov 0   ;;  %s1058_s13 = smov 0   ;;  %s1258_s0 = inlined_call_operand.vmem [shape: f32[512,64], index: 0, kind: input, shape index: {}]   ;;  %s1259_s1 = inlined_call_operand.vmem [shape: bf16[64,16], index: 1, kind: input, shape index: {}]   ;;  %s1260_s2 = inlined_call_operand.vmem [shape: f32[1,16], index: 2, kind: input, shape index: {}]   ;;  %s1261_s3 = inlined_call_operand.vmem [shape: bf16[512,16], index: 3, kind: output, shape index: {}]  }
   0x1   :  { %s1060_s14 = smov 0  }
   0x2 LB: > { %s25_s15 = sadd.s32 1, %s1030_s13  ;;  %p824_p0 = scmp.ge.s32.totalorder %s1034_s14, 1  ;;  %s1034_s14 = sphi %s1060_s14, %s13_s14   ;;  %s1030_s13 = sphi %s1058_s13, %s1263_s13   ;;  %s1026_s12 = sphi %s1056_s12, %s1262_s12  }
   0x3   : > { %p27_p1 = scmp.ge.s32.totalorder %s25_s15, 2  ;;  %p169_p2 = scmp.lt.s32.totalorder %s1034_s14, 3 }
   0x5   : > { %s1265_s15 = smov (%p27_p1, %s25_s15), 0  ;;  %p170_p3 = pnand %p824_p0, %p169_p2 }
   0x6   : > { %s825_s18 = sshll.u32 (!%p170_p3), %s1026_s12, 5 }
   0x7   : > { %173 = sbr.rel (%p170_p3) target bundleno = 260 (0x104), region = 32  ;;  %p204_p4 = scmp.lt.s32.totalorder (!%p170_p3), %s825_s18, 63 }
   0xc   : > { %v1008_v0 = vld [vmem:[%s1259_s1 + $0x18] sm:$0xff]   ;;  %v1009_v1 = vld [vmem:[%s1259_s1 + $0x10] sm:$0xff]   ;;  %s1267_s18 = smov (!%p204_p4, %s825_s18), 63  ;;  %v1010_v2 = vld [vmem:[%s1259_s1 + $0x8] sm:$0xff]   ;;  %vm313_vm0 = vcmask 523264   ;;  %vm683_vm1 = vcmask 125952  }
   0xd   : > { %936 = vmatprep.subr.bf16.mxu0 %v1008_v0  ;;  %976 = vmatprep.subr.bf16.mxu1 %v1008_v0  ;;  %s826_s23 = sshll.u32 %s1267_s18, 3  ;;  %v1011_v6 = vld [vmem:[%s1259_s1] sm:$0xff]   ;;  %s828_s4 = sshll.u32 %s1267_s18, 2 }
   0xe   : > { %937 = vmatpush3.bf16.msra.mxu0 %v1008_v0  ;;  %980 = vmatpush3.bf16.msra.mxu1 %v1008_v0  ;;  %s1089_s26 = scalar_lea.vmem %s1258_s0, %s826_s23  ;;  %v1145_v52 = vld [vmem:[%s1260_s2] ss:$0 sm:$0xff]  ;;  %s1155_s7 = scalar_lea.vmem %s1261_s3, %s828_s4 }
   0xf   : > { %938 = vmatprep.subr.bf16.mxu0 %v1009_v1  ;;  %977 = vmatprep.subr.bf16.mxu1 %v1009_v1  ;;  %v226_v3 = vld [vmem:[%s1089_s26] sm:$0xff]  ;;  %v227_v4 = vld [vmem:[%s1089_s26 + $0x8] sm:$0xff]  ;;  %v228_v10 = vld [vmem:[%s1089_s26 + $0x10] sm:$0xff] }
  0x10   : > { %v242_v5 = vld [vmem:[%s1089_s26 + $0x80] sm:$0xff]  ;;  %v258_v7 = vpack.c.bf16 %v227_v4, %v226_v3  ;;  %v243_v8 = vld [vmem:[%s1089_s26 + $0x88] sm:$0xff]  ;;  %v229_v11 = vld [vmem:[%s1089_s26 + $0x18] sm:$0xff] }
  0x11   : > { %v266_v9 = vpack.c.bf16 %v243_v8, %v242_v5  ;;  %v244_v12 = vld [vmem:[%s1089_s26 + $0x90] sm:$0xff]  ;;  %v245_v13 = vld [vmem:[%s1089_s26 + $0x98] sm:$0xff]  ;;  %v230_v14 = vld [vmem:[%s1089_s26 + $0x20] sm:$0xff]  ;;  %v259_v18 = vpack.c.bf16 %v229_v11, %v228_v10 }
  0x12   : > { %939 = vmatpush3.bf16.msra.mxu0 %v1009_v1  ;;  %981 = vmatpush3.bf16.msra.mxu1 %v1009_v1  ;;  %v231_v15 = vld [vmem:[%s1089_s26 + $0x28] sm:$0xff]  ;;  %v246_v16 = vld [vmem:[%s1089_s26 + $0xa0] sm:$0xff]  ;;  %v267_v19 = vpack.c.bf16 %v245_v13, %v244_v12  ;;  %v232_v22 = vld [vmem:[%s1089_s26 + $0x30] sm:$0xff] }
  0x13   : > { %940 = vmatprep.subr.bf16.mxu0 %v1010_v2  ;;  %978 = vmatprep.subr.bf16.mxu1 %v1010_v2  ;;  %v247_v17 = vld [vmem:[%s1089_s26 + $0xa8] sm:$0xff]  ;;  %v260_v20 = vpack.c.bf16 %v231_v15, %v230_v14  ;;  %v233_v23 = vld [vmem:[%s1089_s26 + $0x38] sm:$0xff]  ;;  %v248_v24 = vld [vmem:[%s1089_s26 + $0xb0] sm:$0xff] }
  0x14   : > { %944 = vmatprep.mubr.msk.bf16.mxu0 %vm313_vm0, %v258_v7  ;;  %960 = vmatprep.mubr.msk.bf16.mxu1 %vm313_vm0, %v266_v9  ;;  %v268_v21 = vpack.c.bf16 %v247_v17, %v246_v16  ;;  %v249_v25 = vld [vmem:[%s1089_s26 + $0xb8] sm:$0xff]  ;;  %v234_v26 = vld [vmem:[%s1089_s26 + $0x40] sm:$0xff]  ;;  %v235_v27 = vld [vmem:[%s1089_s26 + $0x48] sm:$0xff]  ;;  %v261_v30 = vpack.c.bf16 %v233_v23, %v232_v22 }
  0x15   : > { %v250_v28 = vld [vmem:[%s1089_s26 + $0xc0] sm:$0xff]  ;;  %v251_v29 = vld [vmem:[%s1089_s26 + $0xc8] sm:$0xff]  ;;  %v269_v31 = vpack.c.bf16 %v249_v25, %v248_v24  ;;  %v262_v32 = vpack.c.bf16 %v235_v27, %v234_v26  ;;  %v236_v34 = vld [vmem:[%s1089_s26 + $0x50] sm:$0xff] }
  0x16   : > { %941 = vmatpush3.bf16.msra.mxu0 %v1010_v2  ;;  %982 = vmatpush3.bf16.msra.mxu1 %v1010_v2  ;;  %v270_v33 = vpack.c.bf16 %v251_v29, %v250_v28  ;;  %v237_v35 = vld [vmem:[%s1089_s26 + $0x58] sm:$0xff]  ;;  %v252_v36 = vld [vmem:[%s1089_s26 + $0xd0] sm:$0xff]  ;;  %v238_v38 = vld [vmem:[%s1089_s26 + $0x60] sm:$0xff] }
  0x17   : > { %942 = vmatprep.subr.bf16.mxu0 %v1011_v6  ;;  %979 = vmatprep.subr.bf16.mxu1 %v1011_v6  ;;  %v253_v37 = vld [vmem:[%s1089_s26 + $0xd8] sm:$0xff]  ;;  %v239_v39 = vld [vmem:[%s1089_s26 + $0x68] sm:$0xff]  ;;  %v254_v40 = vld [vmem:[%s1089_s26 + $0xe0] sm:$0xff]  ;;  %v263_v42 = vpack.c.bf16 %v237_v35, %v236_v34 }
  0x18   : > { %v255_v41 = vld [vmem:[%s1089_s26 + $0xe8] sm:$0xff]  ;;  %v271_v43 = vpack.c.bf16 %v253_v37, %v252_v36  ;;  %v264_v44 = vpack.c.bf16 %v239_v39, %v238_v38  ;;  %v240_v46 = vld [vmem:[%s1089_s26 + $0x70] sm:$0xff]  ;;  %v241_v47 = vld [vmem:[%s1089_s26 + $0x78] sm:$0xff] }
  0x19   : > { %v272_v45 = vpack.c.bf16 %v255_v41, %v254_v40  ;;  %v256_v48 = vld [vmem:[%s1089_s26 + $0xf0] sm:$0xff]  ;;  %v257_v49 = vld [vmem:[%s1089_s26 + $0xf8] sm:$0xff]  ;;  %v265_v50 = vpack.c.bf16 %v241_v47, %v240_v46 }
  0x1a   : > { %943 = vmatpush3.bf16.msra.mxu0 %v1011_v6  ;;  %983 = vmatpush3.bf16.msra.mxu1 %v1011_v6  ;;  %v273_v51 = vpack.c.bf16 %v257_v49, %v256_v48 }
  0x1d   : > { %945 = vmatmul.mubr.msk.bf16.vlgmr.msra.gmra.mxu0 %vm313_vm0, %v259_v18  ;;  %961 = vmatmul.mubr.msk.bf16.vlgmr.msra.gmra.mxu1 %vm313_vm0, %v267_v19 }
  0x1e   : > { %948 = vmatprep.mubr.msk.bf16.mxu0 %vm313_vm0, %v260_v20  ;;  %964 = vmatprep.mubr.msk.bf16.mxu1 %vm313_vm0, %v268_v21 }
  0x25   : > { %949 = vmatmul.mubr.msk.bf16.gmra.mxu0 %vm313_vm0, %v261_v30  ;;  %965 = vmatmul.mubr.msk.bf16.gmra.mxu1 %vm313_vm0, %v269_v31 }
  0x26   : > { %952 = vmatprep.mubr.msk.bf16.mxu0 %vm313_vm0, %v262_v32  ;;  %968 = vmatprep.mubr.msk.bf16.mxu1 %vm313_vm0, %v270_v33 }
  0x2d   : > { %953 = vmatmul.mubr.msk.bf16.gmra.mxu0 %vm313_vm0, %v263_v42  ;;  %969 = vmatmul.mubr.msk.bf16.gmra.mxu1 %vm313_vm0, %v271_v43 }
  0x2e   : > { %956 = vmatprep.mubr.msk.bf16.mxu0 %vm313_vm0, %v264_v44  ;;  %972 = vmatprep.mubr.msk.bf16.mxu1 %vm313_vm0, %v272_v45 }
  0x35   : > { %957 = vmatmul.mubr.msk.bf16.gmra.mxu0 %vm313_vm0, %v265_v50  ;;  %973 = vmatmul.mubr.msk.bf16.gmra.mxu1 %vm313_vm0, %v273_v51 }
  0xdd   : > { %v946_v53 = vpop.f32.mrf.mxu0  ;;  %v962_v54 = vpop.f32.mrf.mxu1 }
  0xde   : > { %v405_v55 = vadd.f32 %v946_v53, %v1145_v52  ;;  %v469_v56 = vadd.f32 %v962_v54, %v1145_v52 }
  0xdf   : > { %v396_v57 = vpop.f32.mrf.mxu0  ;;  %v460_v58 = vpop.f32.mrf.mxu1 }
  0xe0   : > { %v525_v59 = vmax.f32 %v405_v55, 0.0  ;;  %v541_v60 = vmax.f32 %v469_v56, 0.0  ;;  %v397_v61 = vadd.f32 %v1145_v52, %v396_v57  ;;  %v461_v62 = vadd.f32 %v1145_v52, %v460_v58 }
  0xe1   : > { %v947_v63 = vpop.f32.mrf.mxu0  ;;  %v963_v0 = vpop.f32.mrf.mxu1 }
  0xe2   : > { %v886_v1 = vpack.c.bf16 %v525_v59, %v525_v59  ;;  %v902_v2 = vpack.c.bf16 %v541_v60, %v541_v60  ;;  %v523_v3 = vmax.f32 %v397_v61, 0.0  ;;  %v539_v4 = vmax.f32 %v461_v62, 0.0 }
  0xe3   : > { %v408_v5 = vadd.f32 %v947_v63, %v1145_v52  ;;  %v472_v6 = vadd.f32 %v963_v0, %v1145_v52  ;;  %v399_v7 = vpop.f32.mrf.mxu0  ;;  %v463_v8 = vpop.f32.mrf.mxu1 }
  0xe4   : > { %686 = vst.msk [vmem:[%s1155_s7 + $0x8] sm:$0xf] %vm683_vm1, %v886_v1  ;;  %702 = vst.msk [vmem:[%s1155_s7 + $0x48] sm:$0xf] %vm683_vm1, %v902_v2  ;;  %v884_v9 = vpack.c.bf16 %v523_v3, %v523_v3  ;;  %v900_v10 = vpack.c.bf16 %v539_v4, %v539_v4  ;;  %v400_v11 = vadd.f32 %v1145_v52, %v399_v7 }
  0xe5   : > { %v464_v12 = vadd.f32 %v1145_v52, %v463_v8  ;;  %v526_v13 = vmax.f32 %v408_v5, 0.0  ;;  %v542_v14 = vmax.f32 %v472_v6, 0.0  ;;  %v950_v15 = vpop.f32.mrf.mxu0  ;;  %v966_v16 = vpop.f32.mrf.mxu1 }
  0xe6   : > { %684 = vst.msk [vmem:[%s1155_s7] sm:$0xf] %vm683_vm1, %v884_v9  ;;  %700 = vst.msk [vmem:[%s1155_s7 + $0x40] sm:$0xf] %vm683_vm1, %v900_v10  ;;  %v524_v17 = vmax.f32 %v400_v11, 0.0  ;;  %v421_v19 = vadd.f32 %v950_v15, %v1145_v52  ;;  %v485_v20 = vadd.f32 %v966_v16, %v1145_v52 }
  0xe7   : > { %v540_v18 = vmax.f32 %v464_v12, 0.0  ;;  %v887_v21 = vpack.c.bf16 %v526_v13, %v526_v13  ;;  %v903_v22 = vpack.c.bf16 %v542_v14, %v542_v14  ;;  %v412_v23 = vpop.f32.mrf.mxu0  ;;  %v476_v24 = vpop.f32.mrf.mxu1 }
  0xe8   : > { %v885_v25 = vpack.c.bf16 %v524_v17, %v524_v17  ;;  %v529_v27 = vmax.f32 %v421_v19, 0.0  ;;  %v545_v28 = vmax.f32 %v485_v20, 0.0  ;;  %v413_v29 = vadd.f32 %v1145_v52, %v412_v23 }
  0xe9   : > { %v901_v26 = vpack.c.bf16 %v540_v18, %v540_v18  ;;  %687 = vst.msk [vmem:[%s1155_s7 + $0xc] sm:$0xf] %vm683_vm1, %v887_v21  ;;  %703 = vst.msk [vmem:[%s1155_s7 + $0x4c] sm:$0xf] %vm683_vm1, %v903_v22  ;;  %v477_v30 = vadd.f32 %v1145_v52, %v476_v24  ;;  %v951_v31 = vpop.f32.mrf.mxu0  ;;  %v967_v32 = vpop.f32.mrf.mxu1 }
  0xea   : > { %685 = vst.msk [vmem:[%s1155_s7 + $0x4] sm:$0xf] %vm683_vm1, %v885_v25  ;;  %v890_v33 = vpack.c.bf16 %v529_v27, %v529_v27  ;;  %v906_v34 = vpack.c.bf16 %v545_v28, %v545_v28  ;;  %v424_v35 = vadd.f32 %v951_v31, %v1145_v52  ;;  %v488_v36 = vadd.f32 %v967_v32, %v1145_v52 }
  0xeb   : > { %701 = vst.msk [vmem:[%s1155_s7 + $0x44] sm:$0xf] %vm683_vm1, %v901_v26  ;;  %v527_v37 = vmax.f32 %v413_v29, 0.0  ;;  %v543_v38 = vmax.f32 %v477_v30, 0.0  ;;  %v415_v39 = vpop.f32.mrf.mxu0  ;;  %v479_v40 = vpop.f32.mrf.mxu1 }
  0xec   : > { %690 = vst.msk [vmem:[%s1155_s7 + $0x18] sm:$0xf] %vm683_vm1, %v890_v33  ;;  %706 = vst.msk [vmem:[%s1155_s7 + $0x58] sm:$0xf] %vm683_vm1, %v906_v34  ;;  %v530_v41 = vmax.f32 %v424_v35, 0.0  ;;  %v546_v42 = vmax.f32 %v488_v36, 0.0  ;;  %v416_v43 = vadd.f32 %v1145_v52, %v415_v39  ;;  %v480_v44 = vadd.f32 %v1145_v52, %v479_v40 }
  0xed   : > { %v888_v45 = vpack.c.bf16 %v527_v37, %v527_v37  ;;  %v904_v46 = vpack.c.bf16 %v543_v38, %v543_v38  ;;  %v954_v47 = vpop.f32.mrf.mxu0  ;;  %v970_v48 = vpop.f32.mrf.mxu1 }
  0xee   : > { %v891_v49 = vpack.c.bf16 %v530_v41, %v530_v41  ;;  %v907_v50 = vpack.c.bf16 %v546_v42, %v546_v42  ;;  %v528_v51 = vmax.f32 %v416_v43, 0.0  ;;  %v544_v53 = vmax.f32 %v480_v44, 0.0 }
  0xef   : > { %688 = vst.msk [vmem:[%s1155_s7 + $0x10] sm:$0xf] %vm683_vm1, %v888_v45  ;;  %704 = vst.msk [vmem:[%s1155_s7 + $0x50] sm:$0xf] %vm683_vm1, %v904_v46  ;;  %v437_v54 = vadd.f32 %v954_v47, %v1145_v52  ;;  %v501_v55 = vadd.f32 %v970_v48, %v1145_v52  ;;  %v428_v56 = vpop.f32.mrf.mxu0  ;;  %v492_v57 = vpop.f32.mrf.mxu1 }
  0xf0   : > { %691 = vst.msk [vmem:[%s1155_s7 + $0x1c] sm:$0xf] %vm683_vm1, %v891_v49  ;;  %707 = vst.msk [vmem:[%s1155_s7 + $0x5c] sm:$0xf] %vm683_vm1, %v907_v50  ;;  %v889_v58 = vpack.c.bf16 %v528_v51, %v528_v51  ;;  %v905_v59 = vpack.c.bf16 %v544_v53, %v544_v53  ;;  %v429_v60 = vadd.f32 %v1145_v52, %v428_v56 }
  0xf1   : > { %v493_v61 = vadd.f32 %v1145_v52, %v492_v57  ;;  %v533_v62 = vmax.f32 %v437_v54, 0.0  ;;  %v549_v63 = vmax.f32 %v501_v55, 0.0  ;;  %v955_v0 = vpop.f32.mrf.mxu0  ;;  %v971_v1 = vpop.f32.mrf.mxu1 }
  0xf2   : > { %689 = vst.msk [vmem:[%s1155_s7 + $0x14] sm:$0xf] %vm683_vm1, %v889_v58  ;;  %705 = vst.msk [vmem:[%s1155_s7 + $0x54] sm:$0xf] %vm683_vm1, %v905_v59  ;;  %v531_v2 = vmax.f32 %v429_v60, 0.0  ;;  %v440_v4 = vadd.f32 %v955_v0, %v1145_v52  ;;  %v504_v5 = vadd.f32 %v971_v1, %v1145_v52 }
  0xf3   : > { %v547_v3 = vmax.f32 %v493_v61, 0.0  ;;  %v894_v6 = vpack.c.bf16 %v533_v62, %v533_v62  ;;  %v910_v7 = vpack.c.bf16 %v549_v63, %v549_v63  ;;  %v431_v8 = vpop.f32.mrf.mxu0  ;;  %v495_v9 = vpop.f32.mrf.mxu1 }
  0xf4   : > { %v892_v10 = vpack.c.bf16 %v531_v2, %v531_v2  ;;  %v534_v12 = vmax.f32 %v440_v4, 0.0  ;;  %v550_v13 = vmax.f32 %v504_v5, 0.0  ;;  %v432_v14 = vadd.f32 %v1145_v52, %v431_v8 }
  0xf5   : > { %v908_v11 = vpack.c.bf16 %v547_v3, %v547_v3  ;;  %694 = vst.msk [vmem:[%s1155_s7 + $0x28] sm:$0xf] %vm683_vm1, %v894_v6  ;;  %710 = vst.msk [vmem:[%s1155_s7 + $0x68] sm:$0xf] %vm683_vm1, %v910_v7  ;;  %v496_v15 = vadd.f32 %v1145_v52, %v495_v9  ;;  %v958_v16 = vpop.f32.mrf.mxu0  ;;  %v974_v17 = vpop.f32.mrf.mxu1 }
  0xf6   : > { %692 = vst.msk [vmem:[%s1155_s7 + $0x20] sm:$0xf] %vm683_vm1, %v892_v10  ;;  %v895_v18 = vpack.c.bf16 %v534_v12, %v534_v12  ;;  %v911_v19 = vpack.c.bf16 %v550_v13, %v550_v13  ;;  %v453_v20 = vadd.f32 %v958_v16, %v1145_v52  ;;  %v517_v21 = vadd.f32 %v974_v17, %v1145_v52 }
  0xf7   : > { %708 = vst.msk [vmem:[%s1155_s7 + $0x60] sm:$0xf] %vm683_vm1, %v908_v11  ;;  %v532_v22 = vmax.f32 %v432_v14, 0.0  ;;  %v548_v23 = vmax.f32 %v496_v15, 0.0  ;;  %v444_v24 = vpop.f32.mrf.mxu0  ;;  %v508_v25 = vpop.f32.mrf.mxu1 }
  0xf8   : > { %695 = vst.msk [vmem:[%s1155_s7 + $0x2c] sm:$0xf] %vm683_vm1, %v895_v18  ;;  %711 = vst.msk [vmem:[%s1155_s7 + $0x6c] sm:$0xf] %vm683_vm1, %v911_v19  ;;  %v537_v26 = vmax.f32 %v453_v20, 0.0  ;;  %v553_v27 = vmax.f32 %v517_v21, 0.0  ;;  %v445_v28 = vadd.f32 %v1145_v52, %v444_v24  ;;  %v509_v29 = vadd.f32 %v1145_v52, %v508_v25 }
  0xf9   : > { %v893_v30 = vpack.c.bf16 %v532_v22, %v532_v22  ;;  %v909_v31 = vpack.c.bf16 %v548_v23, %v548_v23  ;;  %v959_v32 = vpop.f32.mrf.mxu0  ;;  %v975_v33 = vpop.f32.mrf.mxu1 }
  0xfa   : > { %v898_v34 = vpack.c.bf16 %v537_v26, %v537_v26  ;;  %v914_v35 = vpack.c.bf16 %v553_v27, %v553_v27  ;;  %v535_v36 = vmax.f32 %v445_v28, 0.0  ;;  %v551_v37 = vmax.f32 %v509_v29, 0.0 }
  0xfb   : > { %693 = vst.msk [vmem:[%s1155_s7 + $0x24] sm:$0xf] %vm683_vm1, %v893_v30  ;;  %709 = vst.msk [vmem:[%s1155_s7 + $0x64] sm:$0xf] %vm683_vm1, %v909_v31  ;;  %v456_v38 = vadd.f32 %v959_v32, %v1145_v52  ;;  %v520_v39 = vadd.f32 %v975_v33, %v1145_v52  ;;  %v447_v40 = vpop.f32.mrf.mxu0  ;;  %v511_v41 = vpop.f32.mrf.mxu1 }
  0xfc   : > { %698 = vst.msk [vmem:[%s1155_s7 + $0x38] sm:$0xf] %vm683_vm1, %v898_v34  ;;  %714 = vst.msk [vmem:[%s1155_s7 + $0x78] sm:$0xf] %vm683_vm1, %v914_v35  ;;  %v896_v42 = vpack.c.bf16 %v535_v36, %v535_v36  ;;  %v912_v43 = vpack.c.bf16 %v551_v37, %v551_v37  ;;  %v448_v44 = vadd.f32 %v1145_v52, %v447_v40 }
  0xfd   : > { %v512_v45 = vadd.f32 %v1145_v52, %v511_v41  ;;  %v538_v46 = vmax.f32 %v456_v38, 0.0  ;;  %v554_v47 = vmax.f32 %v520_v39, 0.0 }
  0xfe   : > { %696 = vst.msk [vmem:[%s1155_s7 + $0x30] sm:$0xf] %vm683_vm1, %v896_v42  ;;  %712 = vst.msk [vmem:[%s1155_s7 + $0x70] sm:$0xf] %vm683_vm1, %v912_v43  ;;  %v536_v48 = vmax.f32 %v448_v44, 0.0 }
  0xff   : > { %v552_v49 = vmax.f32 %v512_v45, 0.0  ;;  %v899_v50 = vpack.c.bf16 %v538_v46, %v538_v46  ;;  %v915_v51 = vpack.c.bf16 %v554_v47, %v554_v47 }
 0x100   : > { %v897_v53 = vpack.c.bf16 %v536_v48, %v536_v48 }
 0x101   : > { %v913_v54 = vpack.c.bf16 %v552_v49, %v552_v49  ;;  %699 = vst.msk [vmem:[%s1155_s7 + $0x3c] sm:$0xf] %vm683_vm1, %v899_v50  ;;  %715 = vst.msk [vmem:[%s1155_s7 + $0x7c] sm:$0xf] %vm683_vm1, %v915_v51 }
 0x102   : > { %697 = vst.msk [vmem:[%s1155_s7 + $0x34] sm:$0xf] %vm683_vm1, %v897_v53 }
 0x103   : > { %713 = vst.msk [vmem:[%s1155_s7 + $0x74] sm:$0xf] %vm683_vm1, %v913_v54 }
 0x104 PF: > { %s13_s14 = sadd.s32 1, %s1034_s14   ;;  %s1262_s12 = smov %s1030_s13 }
 0x105   : > { %p10_p5 = scmp.ge.s32.totalorder %s13_s14, 4   ;;  %s1263_s13 = smov %s1265_s15 }
 0x107   :  { %12 = sbr.rel (!%p10_p5) target bundleno = 2 (0x2), region = 68 }

</bundles_post_ra>
